<compile_context>
chip_gen: v6e
topology: v6e:2x2x1
jax: 0.10.0
libtpu: 0.0.40
codegen_flags: <defaults>
</compile_context>

<pallas_src>
import jax
import jax.numpy as jnp
from jax.experimental import pallas as pl
from jax.experimental.pallas import tpu as pltpu


def _linear_select_kernel(z_ref, x_ref, w_ref, b_ref, o_ref, acc_ref):
    # z_ref  : SMEM (1,) int32   -- layer index (consumed by index_maps; unused here)
    # x_ref  : VMEM (tm, tk)
    # w_ref  : VMEM (tk, tn)     -- selected layer's weight, ALREADY (in, out) layout
    # b_ref  : VMEM (1, tn)      -- selected layer's bias
    # o_ref  : VMEM (tm, tn)
    # acc_ref: VMEM (tm, tn) f32 scratch accumulator
    del z_ref
    k = pl.program_id(2)
    nk = pl.num_programs(2)

    @pl.when(k == 0)
    def _init():
        acc_ref[...] = jnp.zeros_like(acc_ref)

    # No transpose: weight is stored (in_features, out_features) per layer.
    acc_ref[...] += jnp.dot(x_ref[...], w_ref[...],
                            preferred_element_type=jnp.float32)

    @pl.when(k == nk - 1)
    def _finalize():
        # Bias add + cast only once, after K accumulation.
        o_ref[...] = (acc_ref[...] + b_ref[...]).astype(o_ref.dtype)


def _pick_tile(dim, candidates):
    """Largest aligned candidate that divides dim; else the full extent.

    A block equal to the full array extent is always legal even if it is not
    (8,128)-aligned, so the fallback keeps tiny demo shapes working.
    """
    for c in candidates:
        if dim % c == 0 and dim >= c:
            return c
    return dim


def add_pre_forward(x, wT_stacked, b_stacked, z):
    """Apply linear layer `z` (0 or 1) to x:  out = x @ W[z].T + b[z].

    x          : (B, E) float32
    wT_stacked : (2, E, E) float32, layer l slice is W_l.T, i.e. (in, out) layout
    b_stacked  : (2, 1, E) float32
    z          : scalar int (python int or int32 array), layer index
    """
    B, E = x.shape

    # Clamp the layer index so a bad z can't DMA out-of-bounds weights.
    z_arr = jnp.clip(jnp.asarray(z, dtype=jnp.int32), 0, 1).reshape((1,))

    # Tile selection: lane dim multiples of 128 (256 preferred for v6e/v7x MXU),
    # sublane (M) multiples of 8.  Fall back to full extents for small dims.
    tm = _pick_tile(B, (256, 128, 64, 32, 16, 8))
    tn = _pick_tile(E, (256, 128))
    tk = _pick_tile(E, (512, 256, 128))

    grid = (B // tm, E // tn, E // tk)

    grid_spec = pltpu.PrefetchScalarGridSpec(
        num_scalar_prefetch=1,
        grid=grid,
        in_specs=[
            # x: (tm, tk) tile indexed by (M, K)
            pl.BlockSpec((tm, tk), lambda i, j, k, z: (i, k)),
            # stacked (in, out) weights: pick layer z, tile (tk, tn) by (K, N)
            pl.BlockSpec((pl.Squeezed(), tk, tn),
                         lambda i, j, k, z: (z[0], k, j)),
            # stacked biases: pick layer z, tile (1, tn) by N
            pl.BlockSpec((pl.Squeezed(), 1, tn),
                         lambda i, j, k, z: (z[0], 0, j)),
        ],
        out_specs=pl.BlockSpec((tm, tn), lambda i, j, k, z: (i, j)),
        scratch_shapes=[pltpu.VMEM((tm, tn), jnp.float32)],
    )

    return pl.pallas_call(
        _linear_select_kernel,
        out_shape=jax.ShapeDtypeStruct((B, E), x.dtype),
        grid_spec=grid_spec,
        compiler_params=pltpu.CompilerParams(
            # M/N parallel (shards across v7x's 2 TCs), K (reduction) arbitrary.
            dimension_semantics=("parallel", "parallel", "arbitrary"),
        ),
    )(z_arr, x, wT_stacked, b_stacked)


def _make_params(key, E):
    """PyTorch-style Linear params for two layers, stacked."""
    kw1, kb1, kw2, kb2 = jax.random.split(key, 4)
    bound = 1.0 / (E ** 0.5)
    w1 = jax.random.uniform(kw1, (E, E), jnp.float32, -bound, bound)  # (out, in)
    b1 = jax.random.uniform(kb1, (E,), jnp.float32, -bound, bound)
    w2 = jax.random.uniform(kw2, (E, E), jnp.float32, -bound, bound)
    b2 = jax.random.uniform(kb2, (E,), jnp.float32, -bound, bound)
    w_stacked = jnp.stack([w1, w2], axis=0)                  # (2, E, E) (out, in)
    b_stacked = jnp.stack([b1, b2], axis=0).reshape(2, 1, E)  # (2, 1, E)
    return w_stacked, b_stacked


def _check(x, w_stacked, b_stacked):
    # Pre-transpose ONCE (persistent params): (2, out, in) -> (2, in, out).
    wT_stacked = jnp.swapaxes(w_stacked, 1, 2)
    ok = True
    for z in (0, 1):
        out = jax.block_until_ready(add_pre_forward(x, wT_stacked, b_stacked, z))
        ref = x @ w_stacked[z].T + b_stacked[z]
        ok = ok and bool(jnp.allclose(out, ref, atol=1e-5, rtol=1e-5))
    return ok


if __name__ == "__main__":
    key = jax.random.PRNGKey(0)
    kp_small, kx_small, kp_big, kx_big = jax.random.split(key, 4)

    # Module-native small shapes: batch=8, e_dim=32 (single-block path).
    B, E = 8, 32
    w_s, b_s = _make_params(kp_small, E)
    x_s = jax.random.normal(kx_small, (B, E), jnp.float32)
    ok = _check(x_s, w_s, b_s)

    # Slightly larger shapes to exercise the tiled M/N/K + accumulator path
    # (E=384 -> tn=128, tk=128 -> grid (1, 3, 3)).
    B2, E2 = 16, 384
    w_b, b_b = _make_params(kp_big, E2)
    x_b = jax.random.normal(kx_big, (B2, E2), jnp.float32)
    ok = ok and _check(x_b, w_b, b_b)

    print("KERNEL_OK" if ok else "KERNEL_MISMATCH")
</pallas_src>

<mosaic_0001>
module attributes {stable_mosaic.version = 11 : i64} {
  func.func @_linear_select_kernel(%arg0: i32, %arg1: i32, %arg2: i32, %arg3: memref<1xi32, #tpu.memory_space<smem>>, %arg4: memref<8x32xf32, #tpu.memory_space<vmem>>, %arg5: memref<1x32x32xf32, #tpu.memory_space<vmem>>, %arg6: memref<1x1x32xf32, #tpu.memory_space<vmem>>, %arg7: memref<8x32xf32, #tpu.memory_space<vmem>>, %arg8: memref<8x32xf32, #tpu.memory_space<vmem>>) attributes {dimension_semantics = [#tpu.dimension_semantics<parallel>, #tpu.dimension_semantics<parallel>, #tpu.dimension_semantics<arbitrary>], iteration_bounds = array<i64: 1, 1, 1>, scalar_prefetch = 1 : i64, scratch_operands = 1 : i64, tpu.core_type = #tpu.core_type<tc>, window_params = [{transform_indices = @transform_0, window_bounds = array<i64: 8, 32>}, {transform_indices = @transform_1, window_bounds = array<i64: 1, 32, 32>}, {transform_indices = @transform_2, window_bounds = array<i64: 1, 1, 32>}, {transform_indices = @transform_3, window_bounds = array<i64: 8, 32>}]} {
    %c0_i32 = arith.constant 0 : i32
    %0 = arith.cmpi eq, %arg2, %c0_i32 : i32
    %1 = arith.extui %0 : i1 to i32
    %c0_i32_0 = arith.constant 0 : i32
    %2 = arith.cmpi ne, %1, %c0_i32_0 : i32
    scf.if %2 {
      %cst_11 = arith.constant 0.000000e+00 : f32
      %13 = vector.broadcast %cst_11 : f32 to vector<8x32xf32>
      %c0_12 = arith.constant 0 : index
      %c0_13 = arith.constant 0 : index
      %14 = vector.load %arg8[%c0_12, %c0_13] : memref<8x32xf32, #tpu.memory_space<vmem>>, vector<8x32xf32>
      tpu.vector_store %arg8[%c0_12, %c0_13], %13 {strides = array<i32>} : memref<8x32xf32, #tpu.memory_space<vmem>>, vector<8x32xf32>,
    } else {
    }
    %c0 = arith.constant 0 : index
    %c0_1 = arith.constant 0 : index
    %3 = vector.load %arg8[%c0, %c0_1] : memref<8x32xf32, #tpu.memory_space<vmem>>, vector<8x32xf32>
    %c0_2 = arith.constant 0 : index
    %c0_3 = arith.constant 0 : index
    %4 = vector.load %arg4[%c0_2, %c0_3] : memref<8x32xf32, #tpu.memory_space<vmem>>, vector<8x32xf32>
    %c0_4 = arith.constant 0 : index
    %c0_5 = arith.constant 0 : index
    %c0_6 = arith.constant 0 : index
    %5 = vector.load %arg5[%c0_4, %c0_5, %c0_6] : memref<1x32x32xf32, #tpu.memory_space<vmem>>, vector<1x32x32xf32>
    %6 = vector.shape_cast %5 : vector<1x32x32xf32> to vector<32x32xf32>
    %cst = arith.constant dense<0.000000e+00> : vector<8x32xf32>
    %7 = tpu.matmul %4, %6, %cst {dimension_numbers = #tpu.dot_dimension_numbers<[1], [0], [0], [1], [0, 0, 1, 1], [], []>} : vector<8x32xf32>, vector<32x32xf32>, vector<8x32xf32> -> vector<8x32xf32>
    %8 = arith.addf %3, %7 : vector<8x32xf32>
    %c0_7 = arith.constant 0 : index
    %c0_8 = arith.constant 0 : index
    %9 = vector.load %arg8[%c0_7, %c0_8] : memref<8x32xf32, #tpu.memory_space<vmem>>, vector<8x32xf32>
    tpu.vector_store %arg8[%c0_7, %c0_8], %8 {strides = array<i32>} : memref<8x32xf32, #tpu.memory_space<vmem>>, vector<8x32xf32>,
    %c0_i32_9 = arith.constant 0 : i32
    %10 = arith.cmpi eq, %arg2, %c0_i32_9 : i32
    %11 = arith.extui %10 : i1 to i32
    %c0_i32_10 = arith.constant 0 : i32
    %12 = arith.cmpi ne, %11, %c0_i32_10 : i32
    scf.if %12 {
      %c0_11 = arith.constant 0 : index
      %c0_12 = arith.constant 0 : index
      %13 = vector.load %arg8[%c0_11, %c0_12] : memref<8x32xf32, #tpu.memory_space<vmem>>, vector<8x32xf32>
      %c0_13 = arith.constant 0 : index
      %c0_14 = arith.constant 0 : index
      %c0_15 = arith.constant 0 : index
      %14 = vector.load %arg6[%c0_13, %c0_14, %c0_15] : memref<1x1x32xf32, #tpu.memory_space<vmem>>, vector<1x1x32xf32>
      %15 = vector.shape_cast %14 : vector<1x1x32xf32> to vector<1x32xf32>
      %16 = vector.broadcast %15 : vector<1x32xf32> to vector<8x32xf32>
      %17 = arith.addf %13, %16 : vector<8x32xf32>
      %c0_16 = arith.constant 0 : index
      %c0_17 = arith.constant 0 : index
      %18 = vector.load %arg7[%c0_16, %c0_17] : memref<8x32xf32, #tpu.memory_space<vmem>>, vector<8x32xf32>
      tpu.vector_store %arg7[%c0_16, %c0_17], %17 {strides = array<i32>} : memref<8x32xf32, #tpu.memory_space<vmem>>, vector<8x32xf32>,
    } else {
    }
    return
  }
  func.func @transform_0(%arg0: i32, %arg1: i32, %arg2: i32, %arg3: memref<1xi32, #tpu.memory_space<smem>>) -> (i32, i32) {
    %c0_i32 = arith.constant 0 : i32
    return %arg0, %arg2 : i32, i32
  }
  func.func @transform_1(%arg0: i32, %arg1: i32, %arg2: i32, %arg3: memref<1xi32, #tpu.memory_space<smem>>) -> (i32, i32, i32) {
    %c0 = arith.constant 0 : index
    %0 = memref.load %arg3[%c0] : memref<1xi32, #tpu.memory_space<smem>>
    %c0_i32 = arith.constant 0 : i32
    return %0, %arg2, %arg1 : i32, i32, i32
  }
  func.func @transform_2(%arg0: i32, %arg1: i32, %arg2: i32, %arg3: memref<1xi32, #tpu.memory_space<smem>>) -> (i32, i32, i32) {
    %c0 = arith.constant 0 : index
    %0 = memref.load %arg3[%c0] : memref<1xi32, #tpu.memory_space<smem>>
    %c0_i32 = arith.constant 0 : i32
    %c0_i32_0 = arith.constant 0 : i32
    return %0, %c0_i32, %arg1 : i32, i32, i32
  }
  func.func @transform_3(%arg0: i32, %arg1: i32, %arg2: i32, %arg3: memref<1xi32, #tpu.memory_space<smem>>) -> (i32, i32) {
    %c0_i32 = arith.constant 0 : i32
    return %arg0, %arg1 : i32, i32
  }
}

</mosaic_0001>

<bundles_post_ra>
// kernel: tpu_custom_call.1
= control target key start
LH: loop header
LB: loop body
LE: loop exit
PB: predicated region body
PF: predicated region fallthrough
CT: control target
= control target key end

     0   :  { %10 = vsyncpa [#allocation6], 0  ;;  %s349_s0 = inlined_call_operand.<no memory space> [shape: s32[1], index: 0, kind: input, shape index: {}]   ;;  %s350_s1 = inlined_call_operand.hbm [shape: f32[8,32], index: 1, kind: input, shape index: {}]   ;;  %s351_s2 = inlined_call_operand.hbm [shape: f32[2,32,32], index: 2, kind: input, shape index: {}]   ;;  %s352_s3 = inlined_call_operand.vmem [shape: f32[2,1,32], index: 3, kind: input, shape index: {}]   ;;  %s353_s4 = inlined_call_operand.hbm [shape: f32[8,32], index: 4, kind: output, shape index: {}]  }
   0x1   :  { %11 = vsyncpa [#allocation9], 0 }
   0x2   :  { %12 = vsyncpa [#allocation7], 0  ;;  %s188_s17 = sshll.u32 %s349_s0, 9  ;;  %s280_s18 = smov [#allocation5]  }
   0x3   :  { %s19_s19 = sshll.u32 %s280_s18, 4  ;;  %s318_s22 = scalar_lea.hbm %s351_s2, %s188_s17  ;;  %s20_s19 = int_to_ptr.vmem [resolvable:$true] %s19_s19 }
   0x4   :  { %s220_s23 = scalar_lea.vmem %s20_s19, 128  ;;  %p225_p1 = scmp.lt.s32.totalorder %s20_s19, %s20_s19 }
   0x5   :  { %p221_p0 = scmp.ne.s32.totalorder %s20_s19, %s220_s23  ;;  %p226_p2 = scmp.lt.s32.totalorder %s220_s23, %s220_s23 }
   0x7   :  { %p227_p3 = por %p226_p2, %p225_p1 }
   0x9   :  { %p228_p4 = pnand %p227_p3, %p221_p0 }
   0xb   :  { %231 = shalt.err (!%p228_p4)
}
   0xc   :  { %22 = dma.hbm_to_vmem [thread:$0]  %s350_s1, 128, %s20_s19, [#allocation6]  }
   0xd   :  { %s281_s26 = smov [#allocation8]   ;;  %s232_s28 = scalar_lea.hbm %s318_s22, 512 }
   0xe   :  { %s32_s27 = sshll.u32 %s281_s26, 4  ;;  %p233_p5 = scmp.ne.s32.totalorder %s318_s22, %s232_s28  ;;  %s33_s27 = int_to_ptr.vmem [resolvable:$true] %s32_s27 }
   0xf   :  { %s234_s5 = scalar_lea.hbm %s351_s2, 1024  ;;  %p235_p6 = scmp.lt.s32.totalorder %s318_s22, %s351_s2 }
  0x10   :  { %p236_p7 = scmp.lt.s32.totalorder %s234_s5, %s232_s28 }
  0x12   :  { %p237_p8 = por %p236_p7, %p235_p6 }
  0x14   :  { %p238_p9 = pnand %p237_p8, %p233_p5 }
  0x16   :  { %241 = shalt.err (!%p238_p9)
}
  0x17   :  { %s242_s8 = scalar_lea.vmem %s33_s27, 512  ;;  %p247_p11 = scmp.lt.s32.totalorder %s33_s27, %s33_s27 }
  0x18   :  { %p243_p10 = scmp.ne.s32.totalorder %s33_s27, %s242_s8  ;;  %p248_p12 = scmp.lt.s32.totalorder %s242_s8, %s242_s8 }
  0x1a   :  { %p249_p13 = por %p248_p12, %p247_p11 }
  0x1c   :  { %p250_p0 = pnand %p249_p13, %p243_p10 }
  0x1e   :  { %253 = shalt.err (!%p250_p0)
}
  0x1f   :  { %s282_s1 = smov 128   ;;  %s283_s9 = smov 8  }
  0x20   :  { %38 = dma.hbm_to_vmem [thread:$0]  %s318_s22, 512, %s33_s27, [#allocation9], %s282_s1, %s282_s1, %s283_s9  }
  0x21   :  { %274 = dma.done.wait [#allocation6], 128  }
  0x22   :  { %275 = vsyncadd [#allocation6], 4294967168 }
  0x23   :  { %276 = dma.done.wait [#allocation9], 512  }
  0x24   :  { %277 = vsyncadd [#allocation9], 4294966784  ;;  %vm66_vm0 = vcmask 261120   ;;  %v284_v0 = vmov 0.0   ;;  %vm285_vm1 = vmmov 0   ;;  %v73_v1 = vld [vmem:[#allocation8 + $0x18] sm:$0xff] }
  0x25   :  { %194 = vmatprep.subr.mxu0 %v284_v0  ;;  %202 = vmatprep.mubr.msk.f32.mxu0 %vm285_vm1, %v284_v0  ;;  %67 = vst.msk [vmem:[#allocation2] sm:$0xff] %vm66_vm0, %v284_v0  ;;  %v72_v2 = vld [vmem:[#allocation8 + $0x10] sm:$0xff]  ;;  %v71_v3 = vld [vmem:[#allocation8 + $0x8] sm:$0xff]  ;;  %v70_v4 = vld [vmem:[#allocation8] sm:$0xff]  ;;  %p58_p1 = scmp.lt.s32.totalorder %s349_s0, 1  ;;  %s286_s16 = smov [#allocation10]  }
  0x26   :  { %195 = vmatpush3.msra.mxu0 %v73_v1  ;;  %v69_v5 = vld [vmem:[#allocation5] sm:$0xff]  ;;  %s169_s17 = sshll.u32 %s286_s16, 4  ;;  %s170_s17 = int_to_ptr.vmem [resolvable:$true] %s169_s17 }
  0x27   :  { %196 = vmatprep.subr.mxu0 %v284_v0  ;;  %s355_s0 = smov (!%p58_p1, %s349_s0), 1  ;;  %s254_s18 = scalar_lea.vmem %s170_s17, 128 }
  0x28   :  { %197 = vmatpush3.msra.mxu0 %v72_v2  ;;  %s60_s15 = scalar_lea.vmem %s352_s3, %s355_s0  ;;  %p255_p2 = scmp.ne.s32.totalorder %s170_s17, %s254_s18 }
  0x29   :  { %198 = vmatprep.subr.mxu0 %v284_v0  ;;  %v187_v10 = vld [vmem:[%s60_s15] ss:$0 sm:$0xff]  ;;  %p259_p3 = scmp.lt.s32.totalorder %s170_s17, %s170_s17  ;;  %p260_p4 = scmp.lt.s32.totalorder %s254_s18, %s254_s18 }
  0x2a   :  { %199 = vmatpush3.msra.mxu0 %v71_v3 }
  0x2b   :  { %200 = vmatprep.subr.mxu0 %v284_v0  ;;  %p261_p5 = por %p260_p4, %p259_p3 }
  0x2c   :  { %201 = vmatpush3.msra.mxu0 %v70_v4  ;;  %v68_v6 = vld [vmem:[#allocation2] sm:$0xff] }
  0x2d   :  { %203 = vmatmul.mubr.msk.f32.vlgmr.msra.gmra.mxu0 %vm66_vm0, %v69_v5  ;;  %p262_p6 = pnand %p261_p5, %p255_p2 }
  0xed   :  { %v144_v7 = vpop.f32.mrf.mxu0 }
  0xee   :  { %v148_v8 = vadd.f32 %v144_v7, %v68_v6 }
  0xef   :  { %v204_v9 = vpop.f32.mrf.mxu0 }
  0xf0   :  { %149 = vst.msk [vmem:[#allocation2] sm:$0xff] %vm66_vm0, %v148_v8 }
  0xf7   :  { %v153_v11 = vld [vmem:[#allocation2] sm:$0xff] }
  0xf8   :  { %v161_v12 = vadd.f32 %v187_v10, %v153_v11 }
  0xfa   :  { %162 = vst.msk [vmem:[#allocation10] sm:$0xff] %vm66_vm0, %v161_v12 }
  0xfb   :  { %265 = shalt.err (!%p262_p6)
}
  0xfc   :  { %172 = dma.vmem_to_hbm [thread:$0]  %s170_s17, 128, %s353_s4, [#allocation7]  }
  0xfd   :  { %278 = dma.done.wait [#allocation7], 128  }
  0xfe   :  { %279 = vsyncadd [#allocation7], 4294967168 }
  0xff   :  { %176 = vsyncpa [#allocation6], 1 }
 0x100   :  { %177 = vsyncpa [#allocation9], 1 }
 0x101   :  { %178 = vsyncpa [#allocation7], 1 }

</bundles_post_ra>
